<compile_context>
chip_gen: v7x
topology: tpu7x:2x2x1
jax: 0.10.0
libtpu: 0.0.40
codegen_flags: <defaults>
</compile_context>

<pallas_src>
import functools

import jax
import jax.numpy as jnp
from jax.experimental import pallas as pl
from jax.experimental.pallas import tpu as pltpu


def _round_up(x: int, m: int) -> int:
    return ((x + m - 1) // m) * m


# ----------------------------- Pallas kernels ------------------------------ #
def _heads_kernel(num_actions, obs_ref, w_enc_ref, b_enc_ref, w_head_ref,
                  b_head_ref, out_ref):
    # encode: latent = relu(obs @ W_enc + b_enc); obs cast f32->bf16 in-kernel
    obs = obs_ref[...].astype(jnp.bfloat16)
    latent = jnp.dot(obs, w_enc_ref[...], preferred_element_type=jnp.float32)
    latent = jnp.maximum(latent + b_enc_ref[...], 0.0)           # f32 VPU

    # fused policy+value head: [logits | value | argmax | zero-pad] in one
    # lane-dense 128-wide slab (single bf16 MXU matmul, f32 accumulate)
    head = jnp.dot(latent.astype(jnp.bfloat16), w_head_ref[...],
                   preferred_element_type=jnp.float32)
    head = head + b_head_ref[...]

    # greedy argmax over the first num_actions lanes (VPU/XLU slack; the
    # kernel is DMA-bound so this is effectively free), encoded as f32 at
    # column num_actions+1 of the same output slab.
    n_pad = head.shape[-1]
    col = jax.lax.broadcasted_iota(jnp.int32, head.shape, 1)
    colf = col.astype(jnp.float32)
    valid = col < num_actions
    masked = jnp.where(valid, head, -jnp.inf)
    row_max = jnp.max(masked, axis=-1, keepdims=True)
    amax = jnp.min(jnp.where(masked == row_max, colf, jnp.float32(n_pad)),
                   axis=-1, keepdims=True)                       # first max
    out_ref[...] = jnp.where(col == (num_actions + 1), amax, head)


def _encode_kernel(obs_ref, w_enc_ref, b_enc_ref, lat_ref):
    obs = obs_ref[...].astype(jnp.bfloat16)
    latent = jnp.dot(obs, w_enc_ref[...], preferred_element_type=jnp.float32)
    lat_ref[...] = jnp.maximum(latent + b_enc_ref[...], 0.0)


# ------------------------------ grid selection ----------------------------- #
def _grid_for_batch(b: int, d: int):
    """Pick (tile_b, b_pad, grid).

    * round batch to 16 (bf16 packed (16,128) vreg tile)
    * cap the tile so the double-buffered f32 obs block stays <= ~16 MiB
    * for big batches prefer 2048/1024/... row tiles, but only if the grid
      keeps >= 2 steps (megacore) and padding waste stays <= 25% of the batch
    """
    b16 = _round_up(b, 16)
    cap = max(16, ((2 * 1024 * 1024) // max(d, 1)) // 16 * 16)

    if b16 <= min(1024, cap):
        tile_b = b16
    else:
        tile_b = min(128, cap)
        for cand in (2048, 1024, 512, 256, 128):
            if cand > cap:
                continue
            waste = _round_up(b16, cand) - b16
            if b16 // cand >= 2 and waste * 4 <= b16:
                tile_b = cand
                break
    b_pad = _round_up(b16, tile_b)
    return tile_b, b_pad, (b_pad // tile_b,)


def _pad_batch(obs_flat, b_pad):
    B = obs_flat.shape[0]
    if b_pad == B:
        return obs_flat
    return jnp.pad(obs_flat, ((0, b_pad - B), (0, 0)))


# ------------------------------ pallas_call wrappers ------------------------ #
def _fused_heads_call(obs_flat, w_enc, b_enc, w_head, b_head, *, num_actions):
    """obs_flat: [B, D] f32. Returns padded head slab [B_pad, N_pad] f32."""
    B, D = obs_flat.shape
    H_pad = w_enc.shape[1]
    N_pad = w_head.shape[1]
    tile_b, b_pad, grid = _grid_for_batch(B, D)
    obs_p = _pad_batch(obs_flat, b_pad)

    flops = 2 * b_pad * D * H_pad + 2 * b_pad * H_pad * N_pad
    bytes_accessed = (obs_p.size * 4 + w_enc.size * 2 + w_head.size * 2
                      + b_enc.size * 4 + b_head.size * 4 + b_pad * N_pad * 4)

    return pl.pallas_call(
        functools.partial(_heads_kernel, num_actions),
        out_shape=jax.ShapeDtypeStruct((b_pad, N_pad), jnp.float32),
        grid=grid,
        in_specs=[
            pl.BlockSpec((tile_b, D), lambda i: (i, 0)),      # obs tiled over B
            pl.BlockSpec((D, H_pad), lambda i: (0, 0)),       # weights resident
            pl.BlockSpec((1, H_pad), lambda i: (0, 0)),
            pl.BlockSpec((H_pad, N_pad), lambda i: (0, 0)),
            pl.BlockSpec((1, N_pad), lambda i: (0, 0)),
        ],
        out_specs=pl.BlockSpec((tile_b, N_pad), lambda i: (i, 0)),
        compiler_params=pltpu.CompilerParams(
            dimension_semantics=("parallel",),
            vmem_limit_bytes=32 * 1024 * 1024),
        cost_estimate=pl.CostEstimate(flops=flops, transcendentals=0,
                                      bytes_accessed=bytes_accessed),
    )(obs_p, w_enc, b_enc, w_head, b_head)


def _encode_call(obs_flat, w_enc, b_enc):
    """obs_flat: [B, D] f32. Returns padded latent [B_pad, H_pad] f32."""
    B, D = obs_flat.shape
    H_pad = w_enc.shape[1]
    tile_b, b_pad, grid = _grid_for_batch(B, D)
    obs_p = _pad_batch(obs_flat, b_pad)

    flops = 2 * b_pad * D * H_pad
    bytes_accessed = (obs_p.size * 4 + w_enc.size * 2 + b_enc.size * 4
                      + b_pad * H_pad * 4)

    return pl.pallas_call(
        _encode_kernel,
        out_shape=jax.ShapeDtypeStruct((b_pad, H_pad), jnp.float32),
        grid=grid,
        in_specs=[
            pl.BlockSpec((tile_b, D), lambda i: (i, 0)),
            pl.BlockSpec((D, H_pad), lambda i: (0, 0)),
            pl.BlockSpec((1, H_pad), lambda i: (0, 0)),
        ],
        out_specs=pl.BlockSpec((tile_b, H_pad), lambda i: (i, 0)),
        compiler_params=pltpu.CompilerParams(
            dimension_semantics=("parallel",),
            vmem_limit_bytes=32 * 1024 * 1024),
        cost_estimate=pl.CostEstimate(flops=flops, transcendentals=0,
                                      bytes_accessed=bytes_accessed),
    )(obs_p, w_enc, b_enc)


# ----------------------------- jitted end-to-end paths ---------------------- #
def _forward_impl(params, obs, *, num_actions):
    B = obs.shape[0]
    obs_flat = obs.reshape(B, -1).astype(jnp.float32)    # th.flatten(obs, 1)
    head = _fused_heads_call(obs_flat, params["w_enc"], params["b_enc"],
                             params["w_head"], params["b_head"],
                             num_actions=num_actions)
    pi_logits = head[:B, :num_actions]
    value = head[:B, num_actions:num_actions + 1]
    action = head[:B, num_actions + 1].astype(jnp.int32)  # in-kernel argmax
    return pi_logits, value, action


def _encode_impl(params, obs, *, hidden):
    B = obs.shape[0]
    obs_flat = obs.reshape(B, -1).astype(jnp.float32)
    latent = _encode_call(obs_flat, params["w_enc"], params["b_enc"])
    return latent[:B, :hidden]


# ------------------------------ Model wrapper ------------------------------ #
class PallasBaseModel:
    """Concrete realization of the abstract BaseModel PPO-backbone contract."""

    LANE = 128

    def __init__(self, obs_shape, num_actions, hidden=32, seed=0):
        self.obs_shape = tuple(obs_shape)          # (C, H, W) per sample
        self.num_actions = int(num_actions)
        self.hidden = int(hidden)
        assert self.num_actions + 2 <= self.LANE, \
            "value & argmax columns must fit in the first lane tile"

        D = 1
        for s in self.obs_shape:
            D *= s
        self.D = D
        self.H_pad = _round_up(self.hidden, self.LANE)
        # fused head slab: [num_actions logits | value | argmax | zero pad]
        self.N_pad = _round_up(self.num_actions + 2, self.LANE)

        key = jax.random.PRNGKey(seed)
        k1, k2, k3 = jax.random.split(key, 3)
        # Deterministic synthetic parameters (not a checkpoint load).
        w_enc = jax.random.normal(k1, (D, hidden), jnp.float32) / jnp.sqrt(D)
        w_pi = jax.random.normal(k2, (hidden, num_actions),
                                 jnp.float32) / jnp.sqrt(hidden)
        w_v = jax.random.normal(k3, (hidden, 1), jnp.float32) / jnp.sqrt(hidden)

        # Lane-padded, bf16 weight slabs (zeros in padded rows/cols keep the
        # math identical to the unpadded model).
        w_enc_p = jnp.zeros((D, self.H_pad), jnp.float32).at[:, :hidden].set(w_enc)
        w_head_p = (jnp.zeros((self.H_pad, self.N_pad), jnp.float32)
                    .at[:hidden, :num_actions].set(w_pi)
                    .at[:hidden, num_actions:num_actions + 1].set(w_v))

        self.params = {
            "w_enc": w_enc_p.astype(jnp.bfloat16),
            "b_enc": jnp.zeros((1, self.H_pad), jnp.float32),
            "w_head": w_head_p.astype(jnp.bfloat16),
            "b_head": jnp.zeros((1, self.N_pad), jnp.float32),
        }

        # jit once; forward() and act() share the same compiled function.
        self._forward_jit = jax.jit(
            functools.partial(_forward_impl, num_actions=self.num_actions))
        self._encode_jit = jax.jit(
            functools.partial(_encode_impl, hidden=self.hidden))

    def encode(self, obs):
        return self._encode_jit(self.params, obs)

    def forward(self, obs):
        pi_logits, value, _ = self._forward_jit(self.params, obs)
        return {"pi_logits": pi_logits, "value": value}

    def act(self, obs):
        pi_logits, value, action = self._forward_jit(self.params, obs)
        return {"action": action, "pi_logits": pi_logits, "value": value}

    def compute_losses(self, **kwargs):
        # TODO(synk): abstract in reference (PPO loss defined only in subclasses); no concrete semantics to port.
        raise NotImplementedError


# ---------------------------------- Main ----------------------------------- #
if __name__ == "__main__":
    B, C, Himg, Wimg = 2, 4, 16, 16      # observation_space = Box(shape=(4,16,16))
    NUM_ACTIONS = 8                       # action_space = Discrete(8)

    key = jax.random.PRNGKey(0)
    obs = jax.random.normal(key, (B, C, Himg, Wimg), jnp.float32)

    model = PallasBaseModel(obs_shape=(C, Himg, Wimg), num_actions=NUM_ACTIONS,
                            hidden=32, seed=0)

    out = model.act(obs)
    latent = model.encode(obs)
    jax.block_until_ready(out["pi_logits"])
    jax.block_until_ready(out["value"])
    jax.block_until_ready(out["action"])
    jax.block_until_ready(latent)

    assert out["pi_logits"].shape == (B, NUM_ACTIONS)
    assert out["value"].shape == (B, 1)
    assert out["action"].shape == (B,)
    assert latent.shape == (B, 32)
    assert bool(jnp.all(jnp.isfinite(out["pi_logits"])))
    assert bool(jnp.all(jnp.isfinite(out["value"])))
    # in-kernel greedy argmax must agree with argmax over the returned logits
    assert bool(jnp.all(out["action"] ==
                        jnp.argmax(out["pi_logits"], axis=-1).astype(jnp.int32)))
    print("KERNEL_OK")
</pallas_src>

<mosaic_0001>
module attributes {stable_mosaic.version = 11 : i64} {
  func.func @_heads_kernel(%arg0: i32, %arg1: memref<16x1024xf32, #tpu.memory_space<vmem>>, %arg2: memref<1024x128xbf16, #tpu.memory_space<vmem>>, %arg3: memref<1x128xf32, #tpu.memory_space<vmem>>, %arg4: memref<128x128xbf16, #tpu.memory_space<vmem>>, %arg5: memref<1x128xf32, #tpu.memory_space<vmem>>, %arg6: memref<16x128xf32, #tpu.memory_space<vmem>>) attributes {dimension_semantics = [#tpu.dimension_semantics<parallel>], iteration_bounds = array<i64: 1>, scalar_prefetch = 0 : i64, scratch_operands = 0 : i64, tpu.core_type = #tpu.core_type<tc>, window_params = [{transform_indices = @transform_0, window_bounds = array<i64: 16, 1024>}, {pipeline_mode = #tpu.pipeline_mode<synchronous>, transform_indices = @transform_1, window_bounds = array<i64: 1024, 128>}, {pipeline_mode = #tpu.pipeline_mode<synchronous>, transform_indices = @transform_2, window_bounds = array<i64: 1, 128>}, {pipeline_mode = #tpu.pipeline_mode<synchronous>, transform_indices = @transform_3, window_bounds = array<i64: 128, 128>}, {pipeline_mode = #tpu.pipeline_mode<synchronous>, transform_indices = @transform_4, window_bounds = array<i64: 1, 128>}, {transform_indices = @transform_5, window_bounds = array<i64: 16, 128>}]} {
    %c0 = arith.constant 0 : index
    %c0_0 = arith.constant 0 : index
    %0 = vector.load %arg1[%c0, %c0_0] : memref<16x1024xf32, #tpu.memory_space<vmem>>, vector<16x1024xf32>
    %1 = arith.truncf %0 : vector<16x1024xf32> to vector<16x1024xbf16>
    %c0_1 = arith.constant 0 : index
    %c0_2 = arith.constant 0 : index
    %2 = vector.load %arg2[%c0_1, %c0_2] : memref<1024x128xbf16, #tpu.memory_space<vmem>>, vector<1024x128xbf16>
    %cst = arith.constant dense<0.000000e+00> : vector<16x128xf32>
    %3 = tpu.matmul %1, %2, %cst {dimension_numbers = #tpu.dot_dimension_numbers<[1], [0], [0], [1], [0, 0, 1, 1], [], []>} : vector<16x1024xbf16>, vector<1024x128xbf16>, vector<16x128xf32> -> vector<16x128xf32>
    %c0_3 = arith.constant 0 : index
    %c0_4 = arith.constant 0 : index
    %4 = vector.load %arg3[%c0_3, %c0_4] : memref<1x128xf32, #tpu.memory_space<vmem>>, vector<1x128xf32>
    %5 = vector.broadcast %4 : vector<1x128xf32> to vector<16x128xf32>
    %6 = arith.addf %3, %5 : vector<16x128xf32>
    %cst_5 = arith.constant 0.000000e+00 : f32
    %7 = vector.broadcast %cst_5 : f32 to vector<16x128xf32>
    %8 = arith.maximumf %6, %7 : vector<16x128xf32>
    %9 = arith.truncf %8 : vector<16x128xf32> to vector<16x128xbf16>
    %c0_6 = arith.constant 0 : index
    %c0_7 = arith.constant 0 : index
    %10 = vector.load %arg4[%c0_6, %c0_7] : memref<128x128xbf16, #tpu.memory_space<vmem>>, vector<128x128xbf16>
    %cst_8 = arith.constant dense<0.000000e+00> : vector<16x128xf32>
    %11 = tpu.matmul %9, %10, %cst_8 {dimension_numbers = #tpu.dot_dimension_numbers<[1], [0], [0], [1], [0, 0, 1, 1], [], []>} : vector<16x128xbf16>, vector<128x128xbf16>, vector<16x128xf32> -> vector<16x128xf32>
    %c0_9 = arith.constant 0 : index
    %c0_10 = arith.constant 0 : index
    %12 = vector.load %arg5[%c0_9, %c0_10] : memref<1x128xf32, #tpu.memory_space<vmem>>, vector<1x128xf32>
    %13 = vector.broadcast %12 : vector<1x128xf32> to vector<16x128xf32>
    %14 = arith.addf %11, %13 : vector<16x128xf32>
    %15 = tpu.iota {dimensions = array<i32: 1>} : vector<16x128xi32>
    %16 = arith.sitofp %15 : vector<16x128xi32> to vector<16x128xf32>
    %c8_i32 = arith.constant 8 : i32
    %17 = vector.broadcast %c8_i32 : i32 to vector<16x128xi32>
    %18 = arith.cmpi slt, %15, %17 : vector<16x128xi32>
    %cst_11 = arith.constant 0xFF800000 : f32
    %19 = vector.broadcast %cst_11 : f32 to vector<16x128xf32>
    %20 = arith.select %18, %14, %19 : vector<16x128xi1>, vector<16x128xf32>
    %cst_12 = arith.constant dense<0xFF800000> : vector<16xf32>
    %21 = vector.multi_reduction <maximumf>, %20, %cst_12 [1] : vector<16x128xf32> to vector<16xf32>
    %22 = vector.shape_cast %21 : vector<16xf32> to vector<16x1xf32>
    %23 = vector.broadcast %22 : vector<16x1xf32> to vector<16x128xf32>
    %24 = arith.cmpf oeq, %20, %23 : vector<16x128xf32>
    %cst_13 = arith.constant 1.280000e+02 : f32
    %25 = vector.broadcast %cst_13 : f32 to vector<16x128xf32>
    %26 = arith.select %24, %16, %25 : vector<16x128xi1>, vector<16x128xf32>
    %cst_14 = arith.constant dense<0x7F800000> : vector<16xf32>
    %27 = vector.multi_reduction <minimumf>, %26, %cst_14 [1] : vector<16x128xf32> to vector<16xf32>
    %28 = vector.shape_cast %27 : vector<16xf32> to vector<16x1xf32>
    %c9_i32 = arith.constant 9 : i32
    %29 = vector.broadcast %c9_i32 : i32 to vector<16x128xi32>
    %30 = arith.cmpi eq, %15, %29 : vector<16x128xi32>
    %31 = vector.shape_cast %28 : vector<16x1xf32> to vector<16x1xf32>
    %32 = vector.broadcast %31 : vector<16x1xf32> to vector<16x128xf32>
    %33 = arith.select %30, %32, %14 : vector<16x128xi1>, vector<16x128xf32>
    %c0_15 = arith.constant 0 : index
    %c0_16 = arith.constant 0 : index
    %34 = vector.load %arg6[%c0_15, %c0_16] : memref<16x128xf32, #tpu.memory_space<vmem>>, vector<16x128xf32>
    tpu.vector_store %arg6[%c0_15, %c0_16], %33 {strides = array<i32>} : memref<16x128xf32, #tpu.memory_space<vmem>>, vector<16x128xf32>,
    return
  }
  func.func @transform_0(%arg0: i32) -> (i32, i32) {
    %c0_i32 = arith.constant 0 : i32
    %c0_i32_0 = arith.constant 0 : i32
    return %arg0, %c0_i32 : i32, i32
  }
  func.func @transform_1(%arg0: i32) -> (i32, i32) {
    %c0_i32 = arith.constant 0 : i32
    %c0_i32_0 = arith.constant 0 : i32
    %c0_i32_1 = arith.constant 0 : i32
    return %c0_i32, %c0_i32_0 : i32, i32
  }
  func.func @transform_2(%arg0: i32) -> (i32, i32) {
    %c0_i32 = arith.constant 0 : i32
    %c0_i32_0 = arith.constant 0 : i32
    %c0_i32_1 = arith.constant 0 : i32
    return %c0_i32, %c0_i32_0 : i32, i32
  }
  func.func @transform_3(%arg0: i32) -> (i32, i32) {
    %c0_i32 = arith.constant 0 : i32
    %c0_i32_0 = arith.constant 0 : i32
    %c0_i32_1 = arith.constant 0 : i32
    return %c0_i32, %c0_i32_0 : i32, i32
  }
  func.func @transform_4(%arg0: i32) -> (i32, i32) {
    %c0_i32 = arith.constant 0 : i32
    %c0_i32_0 = arith.constant 0 : i32
    %c0_i32_1 = arith.constant 0 : i32
    return %c0_i32, %c0_i32_0 : i32, i32
  }
  func.func @transform_5(%arg0: i32) -> (i32, i32) {
    %c0_i32 = arith.constant 0 : i32
    %c0_i32_0 = arith.constant 0 : i32
    return %arg0, %c0_i32 : i32, i32
  }
}

</mosaic_0001>

<bundles_post_ra>
// kernel: _forward_impl.1
= control target key start
LH: loop header
LB: loop body
LE: loop exit
PB: predicated region body
PF: predicated region fallthrough
CT: control target
= control target key end

     0   :  { %10 = vsyncpa [#allocation3], 0  ;;  %s1177_s18 = smov [#allocation2]   ;;  %s1308_s0 = inlined_call_operand.vmem [shape: f32[16,1024], index: 0, kind: input, shape index: {}]   ;;  %s1309_s1 = inlined_call_operand.hbm [shape: bf16[1024,128], index: 1, kind: input, shape index: {}]   ;;  %s1310_s2 = inlined_call_operand.vmem [shape: f32[1,128], index: 2, kind: input, shape index: {}]   ;;  %s1311_s3 = inlined_call_operand.vmem [shape: bf16[128,128], index: 3, kind: input, shape index: {}]   ;;  %s1312_s4 = inlined_call_operand.vmem [shape: f32[1,128], index: 4, kind: input, shape index: {}]   ;;  %s1313_s5 = inlined_call_operand.vmem [shape: f32[16,128], index: 5, kind: output, shape index: {}]  }
   0x1   :  { %s18_s19 = sshll.u32 %s1177_s18, 4  ;;  %s1153_s22 = scalar_lea.hbm %s1309_s1, 8192  ;;  %s19_s19 = int_to_ptr.vmem [resolvable:$true] %s18_s19 }
   0x2   :  { %p1154_p0 = scmp.ne.s32.totalorder %s1309_s1, %s1153_s22  ;;  %p1157_p1 = scmp.lt.u32.totalorder %s1153_s22, %s1309_s1 }
   0x4   :  { %p1159_p2 = pnand %p1157_p1, %p1154_p0 }
   0x6   :  { %1162 = shalt.err (!%p1159_p2)
}
   0x7   :  { %s1163_s27 = scalar_lea.vmem %s19_s19, 8192  ;;  %p1168_p4 = scmp.lt.s32.totalorder %s19_s19, %s19_s19 }
   0x8   :  { %p1164_p3 = scmp.ne.s32.totalorder %s19_s19, %s1163_s27  ;;  %p1169_p5 = scmp.lt.s32.totalorder %s1163_s27, %s1163_s27 }
   0xa   :  { %p1170_p6 = por %p1169_p5, %p1168_p4 }
   0xc   :  { %p1171_p7 = pnand %p1170_p6, %p1164_p3 }
   0xe   :  { %1174 = shalt.err (!%p1171_p7)
}
   0xf   :  { %s1178_s28 = smov 64   ;;  %s1179_s29 = smov 4  }
  0x10   :  { %24 = dma.hbm_to_vmem [thread:$0]  %s1309_s1, 8192, %s19_s19, [#allocation3], %s1178_s28, %s1178_s28, %s1179_s29  }
  0x11   :  { %1175 = dma.done.wait [#allocation3], 8192  }
  0x12   :  { %1176 = vsyncadd [#allocation3], 4294959104  ;;  %v1081_v0 = vld [vmem:[#allocation2 + $0x40] sm:$0xff]   ;;  %v1085_v4 = vld [vmem:[#allocation2 + $0x48] sm:$0xff]   ;;  %vm1181_vm0 = vmmov 0  }
  0x13   :  { %v1082_v1 = vld [vmem:[#allocation2 + $0xc0] sm:$0xff]   ;;  %959 = vmatprep.subr.bf16.mxu0 %v1081_v0  ;;  %v1086_v5 = vld [vmem:[#allocation2 + $0xc8] sm:$0xff]   ;;  %v1089_v8 = vld [vmem:[#allocation2 + $0x50] sm:$0xff]  }
  0x14   :  { %v1083_v2 = vld [vmem:[#allocation2] sm:$0xff]   ;;  %981 = vmatprep.subr.bf16.mxu1 %v1082_v1  ;;  %v1087_v6 = vld [vmem:[#allocation2 + $0x8] sm:$0xff]   ;;  %v1090_v9 = vld [vmem:[#allocation2 + $0xd0] sm:$0xff]  }
  0x15   :  { %v1084_v3 = vld [vmem:[#allocation2 + $0x80] sm:$0xff]   ;;  %960 = vmatpush3.bf16.msra.mxu0 %v1083_v2  ;;  %v1088_v7 = vld [vmem:[#allocation2 + $0x88] sm:$0xff]   ;;  %v1091_v10 = vld [vmem:[#allocation2 + $0x10] sm:$0xff]  }
  0x16   :  { %982 = vmatpush3.bf16.msra.mxu1 %v1084_v3  ;;  %961 = vmatprep.subr.bf16.mxu0 %v1085_v4  ;;  %v1092_v11 = vld [vmem:[#allocation2 + $0x90] sm:$0xff]   ;;  %v1093_v12 = vld [vmem:[#allocation2 + $0x58] sm:$0xff]   ;;  %v1097_v16 = vld [vmem:[#allocation2 + $0x60] sm:$0xff]  }
  0x17   :  { %983 = vmatprep.subr.bf16.mxu1 %v1086_v5  ;;  %v1094_v13 = vld [vmem:[#allocation2 + $0xd8] sm:$0xff]   ;;  %v1098_v17 = vld [vmem:[#allocation2 + $0xe0] sm:$0xff]   ;;  %v1101_v20 = vld [vmem:[#allocation2 + $0x68] sm:$0xff]  }
  0x18   :  { %v1095_v14 = vld [vmem:[#allocation2 + $0x18] sm:$0xff]   ;;  %v1099_v18 = vld [vmem:[#allocation2 + $0x20] sm:$0xff]   ;;  %v1102_v21 = vld [vmem:[#allocation2 + $0xe8] sm:$0xff]  }
  0x19   :  { %962 = vmatpush3.bf16.msra.mxu0 %v1087_v6  ;;  %v1096_v15 = vld [vmem:[#allocation2 + $0x98] sm:$0xff]   ;;  %v1100_v19 = vld [vmem:[#allocation2 + $0xa0] sm:$0xff]   ;;  %v1103_v22 = vld [vmem:[#allocation2 + $0x28] sm:$0xff]  }
  0x1a   :  { %984 = vmatpush3.bf16.msra.mxu1 %v1088_v7  ;;  %963 = vmatprep.subr.bf16.mxu0 %v1089_v8  ;;  %v1104_v23 = vld [vmem:[#allocation2 + $0xa8] sm:$0xff]   ;;  %v1105_v24 = vld [vmem:[#allocation2 + $0x70] sm:$0xff]   ;;  %v1109_v28 = vld [vmem:[#allocation2 + $0x78] sm:$0xff]  }
  0x1b   :  { %985 = vmatprep.subr.bf16.mxu1 %v1090_v9  ;;  %v1106_v25 = vld [vmem:[#allocation2 + $0xf0] sm:$0xff]   ;;  %v1110_v29 = vld [vmem:[#allocation2 + $0xf8] sm:$0xff]   ;;  %v36_v32 = vld [vmem:[%s1308_s0 + $0x8] sm:$0xff] }
  0x1c   :  { %v1107_v26 = vld [vmem:[#allocation2 + $0x30] sm:$0xff]   ;;  %v1111_v30 = vld [vmem:[#allocation2 + $0x38] sm:$0xff]   ;;  %v44_v33 = vld [vmem:[%s1308_s0 + $0x48] sm:$0xff] }
  0x1d   :  { %964 = vmatpush3.bf16.msra.mxu0 %v1091_v10  ;;  %v1108_v27 = vld [vmem:[#allocation2 + $0xb0] sm:$0xff]   ;;  %v1112_v31 = vld [vmem:[#allocation2 + $0xb8] sm:$0xff]   ;;  %v52_v35 = vpack.c.bf16 %v44_v33, %v36_v32  ;;  %v35_v37 = vld [vmem:[%s1308_s0] sm:$0xff] }
  0x1e   :  { %986 = vmatpush3.bf16.msra.mxu1 %v1092_v11  ;;  %965 = vmatprep.subr.bf16.mxu0 %v1093_v12  ;;  %v38_v34 = vld [vmem:[%s1308_s0 + $0x18] sm:$0xff]  ;;  %v43_v38 = vld [vmem:[%s1308_s0 + $0x40] sm:$0xff]  ;;  %v37_v41 = vld [vmem:[%s1308_s0 + $0x10] sm:$0xff] }
  0x1f   :  { %987 = vmatprep.subr.bf16.mxu1 %v1094_v13  ;;  %v46_v36 = vld [vmem:[%s1308_s0 + $0x58] sm:$0xff]  ;;  %v51_v40 = vpack.c.bf16 %v43_v38, %v35_v37  ;;  %v45_v42 = vld [vmem:[%s1308_s0 + $0x50] sm:$0xff]  ;;  %610 = vmatprep.mubr.bf16.mxu0 %v52_v35  ;;  %v1113_v44 = vld [vmem:[#allocation2 + $0x140] sm:$0xff]  }
  0x20   :  { %v54_v39 = vpack.c.bf16 %v46_v36, %v38_v34  ;;  %v53_v43 = vpack.c.bf16 %v45_v42, %v37_v41  ;;  %v1114_v45 = vld [vmem:[#allocation2 + $0x1c0] sm:$0xff]   ;;  %v1117_v48 = vld [vmem:[#allocation2 + $0x148] sm:$0xff]   ;;  %v1121_v52 = vld [vmem:[#allocation2 + $0x150] sm:$0xff]  }
  0x21   :  { %966 = vmatpush3.bf16.msra.mxu0 %v1095_v14  ;;  %v1115_v46 = vld [vmem:[#allocation2 + $0x100] sm:$0xff]   ;;  %v1118_v49 = vld [vmem:[#allocation2 + $0x1c8] sm:$0xff]   ;;  %v1122_v53 = vld [vmem:[#allocation2 + $0x1d0] sm:$0xff]  }
  0x22   :  { %988 = vmatpush3.bf16.msra.mxu1 %v1096_v15  ;;  %967 = vmatprep.subr.bf16.mxu0 %v1097_v16  ;;  %v1116_v47 = vld [vmem:[#allocation2 + $0x180] sm:$0xff]   ;;  %v1119_v50 = vld [vmem:[#allocation2 + $0x108] sm:$0xff]   ;;  %v1123_v54 = vld [vmem:[#allocation2 + $0x110] sm:$0xff]  }
  0x23   :  { %989 = vmatprep.subr.bf16.mxu1 %v1098_v17  ;;  %651 = vmatprep.mubr.bf16.mxu1 %v54_v39  ;;  %v1120_v51 = vld [vmem:[#allocation2 + $0x188] sm:$0xff]   ;;  %v1124_v55 = vld [vmem:[#allocation2 + $0x190] sm:$0xff]   ;;  %v1125_v56 = vld [vmem:[#allocation2 + $0x158] sm:$0xff]  }
  0x24   :  { %v1126_v57 = vld [vmem:[#allocation2 + $0x1d8] sm:$0xff]   ;;  %v1129_v60 = vld [vmem:[#allocation2 + $0x160] sm:$0xff]   ;;  %v1133_v0 = vld [vmem:[#allocation2 + $0x168] sm:$0xff]  }
  0x25   :  { %968 = vmatpush3.bf16.msra.mxu0 %v1099_v18  ;;  %v1127_v58 = vld [vmem:[#allocation2 + $0x118] sm:$0xff]   ;;  %v1130_v61 = vld [vmem:[#allocation2 + $0x1e0] sm:$0xff]   ;;  %v1134_v1 = vld [vmem:[#allocation2 + $0x1e8] sm:$0xff]  }
  0x26   :  { %990 = vmatpush3.bf16.msra.mxu1 %v1100_v19  ;;  %969 = vmatprep.subr.bf16.mxu0 %v1101_v20  ;;  %v1128_v59 = vld [vmem:[#allocation2 + $0x198] sm:$0xff]   ;;  %v1131_v62 = vld [vmem:[#allocation2 + $0x120] sm:$0xff]   ;;  %v1135_v2 = vld [vmem:[#allocation2 + $0x128] sm:$0xff]  }
  0x27   :  { %991 = vmatprep.subr.bf16.mxu1 %v1102_v21  ;;  %v1132_v63 = vld [vmem:[#allocation2 + $0x1a0] sm:$0xff]   ;;  %v1136_v3 = vld [vmem:[#allocation2 + $0x1a8] sm:$0xff]   ;;  %v1137_v4 = vld [vmem:[#allocation2 + $0x170] sm:$0xff]  }
  0x28   :  { %v1138_v5 = vld [vmem:[#allocation2 + $0x1f0] sm:$0xff]   ;;  %v1141_v8 = vld [vmem:[#allocation2 + $0x178] sm:$0xff]   ;;  %v40_v12 = vld [vmem:[%s1308_s0 + $0x28] sm:$0xff] }
  0x29   :  { %970 = vmatpush3.bf16.msra.mxu0 %v1103_v22  ;;  %v1139_v6 = vld [vmem:[#allocation2 + $0x130] sm:$0xff]   ;;  %v1142_v9 = vld [vmem:[#allocation2 + $0x1f8] sm:$0xff]   ;;  %v48_v13 = vld [vmem:[%s1308_s0 + $0x68] sm:$0xff] }
  0x2a   :  { %992 = vmatpush3.bf16.msra.mxu1 %v1104_v23  ;;  %971 = vmatprep.subr.bf16.mxu0 %v1105_v24  ;;  %v1140_v7 = vld [vmem:[#allocation2 + $0x1b0] sm:$0xff]   ;;  %v1143_v10 = vld [vmem:[#allocation2 + $0x138] sm:$0xff]   ;;  %v56_v16 = vpack.c.bf16 %v48_v13, %v40_v12  ;;  %v39_v18 = vld [vmem:[%s1308_s0 + $0x20] sm:$0xff] }
  0x2b   :  { %993 = vmatprep.subr.bf16.mxu1 %v1106_v25  ;;  %v1144_v11 = vld [vmem:[#allocation2 + $0x1b8] sm:$0xff]   ;;  %v47_v19 = vld [vmem:[%s1308_s0 + $0x60] sm:$0xff]  ;;  %v41_v20 = vld [vmem:[%s1308_s0 + $0x30] sm:$0xff]  ;;  %v1180_v25 = vmov 0.0  }
  0x2c   :  { %v42_v14 = vld [vmem:[%s1308_s0 + $0x38] sm:$0xff]  ;;  %v55_v21 = vpack.c.bf16 %v47_v19, %v39_v18  ;;  %v49_v22 = vld [vmem:[%s1308_s0 + $0x70] sm:$0xff]  ;;  %v1145_v24 = vld [vmem:[%s1311_s3] sm:$0xff]  }
  0x2d   :  { %972 = vmatpush3.bf16.msra.mxu0 %v1107_v26  ;;  %v50_v15 = vld [vmem:[%s1308_s0 + $0x78] sm:$0xff]  ;;  %v57_v23 = vpack.c.bf16 %v49_v22, %v41_v20  ;;  %v1146_v26 = vld [vmem:[%s1311_s3 + $0x8] sm:$0xff]   ;;  %v885_v35 = vld [vmem:[%s1310_s2] ss:$0 sm:$0xff] }
  0x2e   :  { %994 = vmatpush3.bf16.msra.mxu1 %v1108_v27  ;;  %973 = vmatprep.subr.bf16.mxu0 %v1109_v28  ;;  %v58_v17 = vpack.c.bf16 %v50_v15, %v42_v14  ;;  %v1147_v27 = vld [vmem:[%s1311_s3 + $0x10] sm:$0xff]   ;;  %v1148_v28 = vld [vmem:[%s1311_s3 + $0x18] sm:$0xff]  }
  0x2f   :  { %995 = vmatprep.subr.bf16.mxu1 %v1110_v29  ;;  %v1149_v29 = vld [vmem:[%s1311_s3 + $0x20] sm:$0xff]   ;;  %v1152_v32 = vld [vmem:[%s1311_s3 + $0x38] sm:$0xff]  }
  0x31   :  { %974 = vmatpush3.bf16.msra.mxu0 %v1111_v30  ;;  %v1150_v30 = vld [vmem:[%s1311_s3 + $0x28] sm:$0xff]  }
  0x32   :  { %996 = vmatpush3.bf16.msra.mxu1 %v1112_v31  ;;  %1003 = vmatprep.subr.bf16.mxu0 %v1113_v44  ;;  %v1151_v31 = vld [vmem:[%s1311_s3 + $0x30] sm:$0xff]  }
  0x33   :  { %1025 = vmatprep.subr.bf16.mxu1 %v1114_v45 }
  0x34   :  { %611 = vmatmul.mubr.bf16.vlgmr.msra.gmra.mrb[0].mxu0 %v51_v40 }
  0x35   :  { %652 = vmatmul.mubr.bf16.vlgmr.msra.gmra.mrb[0].mxu1 %v53_v43  ;;  %1004 = vmatpush3.bf16.msra.mxu0 %v1115_v46 }
  0x36   :  { %1026 = vmatpush3.bf16.msra.mxu1 %v1116_v47  ;;  %1005 = vmatprep.subr.bf16.mxu0 %v1117_v48 }
  0x37   :  { %1027 = vmatprep.subr.bf16.mxu1 %v1118_v49  ;;  %692 = vmatprep.mubr.bf16.mxu0 %v56_v16 }
  0x38   :  { %733 = vmatprep.mubr.bf16.mxu1 %v58_v17 }
  0x39   :  { %1006 = vmatpush3.bf16.msra.mxu0 %v1119_v50 }
  0x3a   :  { %1028 = vmatpush3.bf16.msra.mxu1 %v1120_v51  ;;  %1007 = vmatprep.subr.bf16.mxu0 %v1121_v52 }
  0x3b   :  { %1029 = vmatprep.subr.bf16.mxu1 %v1122_v53 }
  0x3d   :  { %1008 = vmatpush3.bf16.msra.mxu0 %v1123_v54 }
  0x3e   :  { %1030 = vmatpush3.bf16.msra.mxu1 %v1124_v55  ;;  %1009 = vmatprep.subr.bf16.mxu0 %v1125_v56 }
  0x3f   :  { %1031 = vmatprep.subr.bf16.mxu1 %v1126_v57 }
  0x41   :  { %1010 = vmatpush3.bf16.msra.mxu0 %v1127_v58 }
  0x42   :  { %1032 = vmatpush3.bf16.msra.mxu1 %v1128_v59  ;;  %1011 = vmatprep.subr.bf16.mxu0 %v1129_v60 }
  0x43   :  { %1033 = vmatprep.subr.bf16.mxu1 %v1130_v61 }
  0x45   :  { %1012 = vmatpush3.bf16.msra.mxu0 %v1131_v62 }
  0x46   :  { %1034 = vmatpush3.bf16.msra.mxu1 %v1132_v63  ;;  %1013 = vmatprep.subr.bf16.mxu0 %v1133_v0 }
  0x47   :  { %1035 = vmatprep.subr.bf16.mxu1 %v1134_v1 }
  0x49   :  { %1014 = vmatpush3.bf16.msra.mxu0 %v1135_v2 }
  0x4a   :  { %1036 = vmatpush3.bf16.msra.mxu1 %v1136_v3  ;;  %1015 = vmatprep.subr.bf16.mxu0 %v1137_v4 }
  0x4b   :  { %1037 = vmatprep.subr.bf16.mxu1 %v1138_v5  ;;  %v857_v5 = vlaneseq }
  0x4d   :  { %1016 = vmatpush3.bf16.msra.mxu0 %v1139_v6  ;;  %v858_v6 = vand.u32 127, %v857_v5 }
  0x4e   :  { %1038 = vmatpush3.bf16.msra.mxu1 %v1140_v7  ;;  %1017 = vmatprep.subr.bf16.mxu0 %v1141_v8  ;;  %v950_v7 = vld [vmem:[%s1312_s4] ss:$0 sm:$0xff] }
  0x4f   :  { %1039 = vmatprep.subr.bf16.mxu1 %v1142_v9  ;;  %vm860_vm1 = vcmp.lt.s32.totalorder %v858_v6, 8  ;;  %v859_v16 = vcvt.s32.f32 %v858_v6  ;;  %vm875_vm4 = vcmp.eq.s32.totalorder %v858_v6, 9 }
  0x51   :  { %1018 = vmatpush3.bf16.msra.mxu0 %v1143_v10 }
  0x52   :  { %1040 = vmatpush3.bf16.msra.mxu1 %v1144_v11  ;;  %1056 = vmatprep.subr.bf16.mxu0 %v1180_v25 }
  0x54   :  { %693 = vmatmul.mubr.bf16.vlgmr.msra.gmra.mrb[4].mxu0 %v55_v21 }
  0x55   :  { %734 = vmatmul.mubr.bf16.vlgmr.msra.gmra.mrb[4].mxu1 %v57_v23  ;;  %1057 = vmatpush3.bf16.msra.mxu0 %v1145_v24 }
  0x56   :  { %1058 = vmatprep.subr.bf16.mxu0 %v1180_v25  ;;  %1072 = vmatprep.mubr.msk.bf16.mxu0 %vm1181_vm0, %v1180_v25 }
  0x59   :  { %1059 = vmatpush3.bf16.msra.mxu0 %v1146_v26 }
  0x5a   :  { %1060 = vmatprep.subr.bf16.mxu0 %v1180_v25 }
  0x5d   :  { %1061 = vmatpush3.bf16.msra.mxu0 %v1147_v27 }
  0x5e   :  { %1062 = vmatprep.subr.bf16.mxu0 %v1180_v25 }
  0x61   :  { %1063 = vmatpush3.bf16.msra.mxu0 %v1148_v28 }
  0x62   :  { %1064 = vmatprep.subr.bf16.mxu0 %v1180_v25 }
  0x65   :  { %1065 = vmatpush3.bf16.msra.mxu0 %v1149_v29 }
  0x66   :  { %1066 = vmatprep.subr.bf16.mxu0 %v1180_v25 }
  0x69   :  { %1067 = vmatpush3.bf16.msra.mxu0 %v1150_v30 }
  0x6a   :  { %1068 = vmatprep.subr.bf16.mxu0 %v1180_v25 }
  0x6d   :  { %1069 = vmatpush3.bf16.msra.mxu0 %v1151_v31 }
  0x6e   :  { %1070 = vmatprep.subr.bf16.mxu0 %v1180_v25 }
  0x71   :  { %1071 = vmatpush3.bf16.msra.mxu0 %v1152_v32 }
 0x107   :  { %v975_v33 = vpop.f32.mrb[0].mxu0 }
 0x108   :  { %v997_v34 = vpop.f32.mrb[0].mxu1  ;;  %v976_v36 = vpop.f32.mrb[1].mxu0 }
 0x109   :  { %v977_v37 = vadd.f32 %v976_v36, %v975_v33  ;;  %v998_v38 = vpop.f32.mrb[1].mxu1  ;;  %v978_v39 = vpop.f32.mrb[2].mxu0 }
 0x10a   :  { %v999_v40 = vadd.f32 %v998_v38, %v997_v34  ;;  %v1000_v41 = vpop.f32.mrb[2].mxu1  ;;  %v979_v42 = vpop.f32.mrb[3].mxu0 }
 0x10b   :  { %v613_v43 = vadd.f32 %v977_v37, %v885_v35  ;;  %v980_v44 = vadd.f32 %v979_v42, %v978_v39  ;;  %v1001_v45 = vpop.f32.mrb[3].mxu1 }
 0x10c   :  { %v1002_v46 = vadd.f32 %v1001_v45, %v1000_v41 }
 0x10d   :  { %v654_v47 = vadd.f32 %v999_v40, %v613_v43  ;;  %v616_v48 = vadd.f32 %v980_v44, %v885_v35 }
 0x10f   :  { %v657_v49 = vadd.f32 %v1002_v46, %v616_v48 }
 0x127   :  { %v1019_v50 = vpop.f32.mrb[4].mxu0 }
 0x128   :  { %v1041_v51 = vpop.f32.mrb[4].mxu1  ;;  %v1020_v52 = vpop.f32.mrb[5].mxu0 }
 0x129   :  { %v1021_v53 = vadd.f32 %v1020_v52, %v1019_v50  ;;  %v1042_v54 = vpop.f32.mrb[5].mxu1  ;;  %v1022_v55 = vpop.f32.mrb[6].mxu0 }
 0x12a   :  { %v1043_v56 = vadd.f32 %v1042_v54, %v1041_v51  ;;  %v1044_v57 = vpop.f32.mrb[6].mxu1  ;;  %v1023_v58 = vpop.f32.mrb[7].mxu0 }
 0x12b   :  { %v695_v59 = vadd.f32 %v1021_v53, %v654_v47  ;;  %v1024_v60 = vadd.f32 %v1023_v58, %v1022_v55  ;;  %v1045_v61 = vpop.f32.mrb[7].mxu1 }
 0x12c   :  { %v1046_v62 = vadd.f32 %v1045_v61, %v1044_v57 }
 0x12d   :  { %v736_v63 = vadd.f32 %v1043_v56, %v695_v59  ;;  %v698_v0 = vadd.f32 %v1024_v60, %v657_v49 }
 0x12f   :  { %v739_v1 = vadd.f32 %v1046_v62, %v698_v0  ;;  %v742_v2 = vmax.f32 %v736_v63, 0.0 }
 0x131   :  { %v743_v3 = vmax.f32 %v739_v1, 0.0 }
 0x133   :  { %v744_v4 = vpack.c.bf16 %v743_v3, %v742_v2 }
 0x135   :  { %1073 = vmatmul.mubr.bf16.vlgmr.msra.gmra.mrb[8].mxu0 %v744_v4 }
 0x208   :  { %v850_v8 = vpop.f32.mrb[8].mxu0 }
 0x209   :  { %v851_v9 = vadd.f32 %v950_v7, %v850_v8  ;;  %v1074_v10 = vpop.f32.mrb[9].mxu0 }
 0x20a   :  { %v853_v11 = vpop.f32.mrb[10].mxu0 }
 0x20b   :  { %v854_v12 = vadd.f32 %v950_v7, %v853_v11  ;;  %v1075_v13 = vpop.f32.mrb[11].mxu0  ;;  %v861_v14 = vsel %vm860_vm1, %v851_v9, -inf }
 0x20c   :  { %863 = vmax.xlane.f32.xlu0 %v861_v14 }
 0x20d   :  { %v862_v15 = vsel %vm860_vm1, %v854_v12, -inf }
 0x210   :  { %865 = vmax.xlane.f32.xlu0 %v862_v15 }
 0x299   :  { %v864_v17 = vpop.xlane.xlu0 %863 }
 0x29a   :  { %vm867_vm2 = vcmp.eq.f32.partialorder %v861_v14, %v864_v17 }
 0x29b   :  { %v869_v18 = vsel %vm867_vm2, %v859_v16, 128.0 }
 0x29c   :  { %871 = vmin.xlane.f32.xlu1 %v869_v18 }
 0x29d   :  { %v866_v19 = vpop.xlane.xlu0 %865 }
 0x29e   :  { %vm868_vm3 = vcmp.eq.f32.partialorder %v862_v15, %v866_v19 }
 0x29f   :  { %v870_v20 = vsel %vm868_vm3, %v859_v16, 128.0 }
 0x2a0   :  { %873 = vmin.xlane.f32.xlu1 %v870_v20 }
 0x329   :  { %v872_v21 = vpop.xlane.xlu1 %871 }
 0x32a   :  { %v876_v22 = vsel %vm875_vm4, %v872_v21, %v851_v9 }
 0x32b   :  { %878 = vst [vmem:[%s1313_s5] sm:$0xff] %v876_v22 }
 0x32d   :  { %v874_v23 = vpop.xlane.xlu1 %873 }
 0x32e   :  { %v877_v24 = vsel %vm875_vm4, %v874_v23, %v854_v12 }
 0x32f   :  { %879 = vst [vmem:[%s1313_s5 + $0x8] sm:$0xff] %v877_v24 }
 0x330   :  { %884 = vsyncpa [#allocation3], 1 }

</bundles_post_ra>
